<compile_context>
chip_gen: v7x
topology: tpu7x:2x2x1
jax: 0.10.0
libtpu: 0.0.40
codegen_flags: <defaults>
</compile_context>

<pallas_src>
import functools

import jax
import jax.numpy as jnp
from jax.experimental import pallas as pl
from jax.experimental.pallas import tpu as pltpu

LEAKY_ALPHA = 0.1   # opt['leaky']
FEATURE_DIM = 16    # opt['feature_dim']
HIDDEN_DIM = 32     # opt['hidden_dim']
RATE = 0.7          # opt['rate']

# Tile sizes (conservative: fit v5e's 16 MiB default scoped VMEM and v7x's 64 MiB
# physical VMEM with double buffering; big enough to amortize per-step overhead).
TM_MAX = 512        # adjacency row tile (sublane axis, multiple of 8)
TK_MAX = 2048       # adjacency column / contraction tile (lane axis, multiple of 128)
TU_MAX = 1024       # row tile for the union kernel
VMEM_LIMIT = 32 * 1024 * 1024


def _round_up(x, m):
    return ((x + m - 1) // m) * m


def _tile(dim, max_tile):
    """Return (tile, padded_dim). Full-extent block when it fits, else aligned max tile."""
    if dim <= max_tile:
        return dim, dim
    return max_tile, _round_up(dim, max_tile)


def _pad_2d(a, rows, cols):
    pr, pc = rows - a.shape[0], cols - a.shape[1]
    if pr == 0 and pc == 0:
        return a
    return jnp.pad(a, ((0, pr), (0, pc)))   # zero padding -> contributes 0 to matmuls


# ----------------------------------------------------------------------------
# Kernel 1a: support = x @ W   (tiny dense matmul, row-tiled, W resident)
# ----------------------------------------------------------------------------
def _support_kernel(x_ref, w_ref, o_ref):
    o_ref[...] = jnp.dot(
        x_ref[...], w_ref[...], preferred_element_type=jnp.float32
    ).astype(o_ref.dtype)


# ----------------------------------------------------------------------------
# Kernel 1b: out = LeakyReLU(adj @ support + b)
#   grid = (row tiles [parallel], K tiles [arbitrary]); f32 VMEM accumulator.
# ----------------------------------------------------------------------------
def _aggregate_kernel(adj_ref, sup_ref, b_ref, o_ref, acc_ref, *, alpha):
    k = pl.program_id(1)

    @pl.when(k == 0)
    def _():
        acc_ref[...] = jnp.zeros_like(acc_ref)

    acc_ref[...] += jnp.dot(
        adj_ref[...], sup_ref[...], preferred_element_type=jnp.float32
    )

    @pl.when(k == pl.num_programs(1) - 1)
    def _():
        out = acc_ref[...] + b_ref[...]
        o_ref[...] = jnp.where(out > 0.0, out, alpha * out).astype(o_ref.dtype)


def gcn(x, adj, w, b, *, alpha=LEAKY_ALPHA):
    """LeakyReLU(adj @ (x @ W) + b) with tiled, pipelined HBM streaming of adj."""
    n_rows_out, n_k = adj.shape
    n_in = x.shape[1]
    n_out = w.shape[1]

    tm, pm = _tile(n_rows_out, TM_MAX)
    tk, pk = _tile(n_k, TK_MAX)

    x_p = _pad_2d(x, pk, n_in)          # padded rows are zero -> support rows are zero
    adj_p = _pad_2d(adj, pm, pk)        # padded rows/cols are zero -> contribute nothing

    # Stage 1: support = x @ W, tiled along the (future) contraction axis.
    support = pl.pallas_call(
        _support_kernel,
        grid=(pk // tk,),
        in_specs=[
            pl.BlockSpec((tk, n_in), lambda i: (i, 0)),
            pl.BlockSpec((n_in, n_out), lambda i: (0, 0)),     # W resident
        ],
        out_specs=pl.BlockSpec((tk, n_out), lambda i: (i, 0)),
        out_shape=jax.ShapeDtypeStruct((pk, n_out), jnp.float32),
        compiler_params=pltpu.CompilerParams(
            dimension_semantics=("parallel",),
            vmem_limit_bytes=VMEM_LIMIT,
        ),
    )(x_p, w)

    # Stage 2: out = LeakyReLU(adj @ support + b), adj streamed tile-by-tile.
    out = pl.pallas_call(
        functools.partial(_aggregate_kernel, alpha=alpha),
        grid=(pm // tm, pk // tk),
        in_specs=[
            pl.BlockSpec((tm, tk), lambda i, k: (i, k)),        # adjacency tile
            pl.BlockSpec((tk, n_out), lambda i, k: (k, 0)),     # support K-slab
            pl.BlockSpec((1, n_out), lambda i, k: (0, 0)),      # bias resident
        ],
        out_specs=pl.BlockSpec((tm, n_out), lambda i, k: (i, 0)),
        out_shape=jax.ShapeDtypeStruct((pm, n_out), jnp.float32),
        scratch_shapes=[pltpu.VMEM((tm, n_out), jnp.float32)],
        compiler_params=pltpu.CompilerParams(
            dimension_semantics=("parallel", "arbitrary"),
            vmem_limit_bytes=VMEM_LIMIT,
        ),
    )(adj_p, support, b.reshape(1, -1))

    return out[:n_rows_out] if pm != n_rows_out else out


# ----------------------------------------------------------------------------
# Kernel 2: fused union-Linear + rate mixing.
#   Rate is folded into the weights/biases on the host; mean/logstd come out as one
#   lane-concatenated (tm, 2F) block and are split in the wrapper.
# ----------------------------------------------------------------------------
def _union_kernel(s_cat_ref, t_cat_ref, s_fea_ref, t_fea_ref,
                  w_sc_ref, w_sf_ref, w_tc_ref, w_tf_ref, b_ref, o_ref):
    out = jnp.dot(s_cat_ref[...], w_sc_ref[...], preferred_element_type=jnp.float32)
    out = out + jnp.dot(s_fea_ref[...], w_sf_ref[...], preferred_element_type=jnp.float32)
    out = out + jnp.dot(t_cat_ref[...], w_tc_ref[...], preferred_element_type=jnp.float32)
    out = out + jnp.dot(t_fea_ref[...], w_tf_ref[...], preferred_element_type=jnp.float32)
    o_ref[...] = (out + b_ref[...]).astype(o_ref.dtype)


def union_mix(s_cat, t_cat, s_fea, t_fea, lin_params, rate):
    """Returns rate-mixed [mean, logstd] as one (n_user, 2F) array."""
    n_user, two_f = s_cat.shape
    fdim = two_f // 2

    def split(w):
        # torch nn.Linear weight layout is (F, 2F); y = x @ W.T with x = [ho, fea].
        return w[:, :fdim].T, w[:, fdim:].T   # (F,F) each

    wsm, bsm = lin_params["source_mean"]
    wsl, bsl = lin_params["source_logstd"]
    wtm, btm = lin_params["target_mean"]
    wtl, btl = lin_params["target_logstd"]

    wh_sm, wf_sm = split(wsm)
    wh_sl, wf_sl = split(wsl)
    wh_tm, wf_tm = split(wtm)
    wh_tl, wf_tl = split(wtl)

    zeros = jnp.zeros((fdim, fdim), jnp.float32)
    rate = jnp.float32(rate)
    # Block-diagonal so one (2F,2F) matmul produces mean (cols :F) and logstd (cols F:).
    w_sc = jnp.block([[wh_sm, zeros], [zeros, wh_sl]]) * rate
    w_tc = jnp.block([[wh_tm, zeros], [zeros, wh_tl]]) * (1.0 - rate)
    w_sf = jnp.concatenate([wf_sm, wf_sl], axis=1) * rate
    w_tf = jnp.concatenate([wf_tm, wf_tl], axis=1) * (1.0 - rate)
    b = (rate * jnp.concatenate([bsm, bsl])
         + (1.0 - rate) * jnp.concatenate([btm, btl])).reshape(1, -1)

    tm, pm = _tile(n_user, TU_MAX)
    s_cat_p = _pad_2d(s_cat, pm, two_f)
    t_cat_p = _pad_2d(t_cat, pm, two_f)
    s_fea_p = _pad_2d(s_fea, pm, fdim)
    t_fea_p = _pad_2d(t_fea, pm, fdim)

    out = pl.pallas_call(
        _union_kernel,
        grid=(pm // tm,),
        in_specs=[
            pl.BlockSpec((tm, two_f), lambda i: (i, 0)),
            pl.BlockSpec((tm, two_f), lambda i: (i, 0)),
            pl.BlockSpec((tm, fdim), lambda i: (i, 0)),
            pl.BlockSpec((tm, fdim), lambda i: (i, 0)),
            pl.BlockSpec((two_f, two_f), lambda i: (0, 0)),     # resident weights
            pl.BlockSpec((fdim, two_f), lambda i: (0, 0)),
            pl.BlockSpec((two_f, two_f), lambda i: (0, 0)),
            pl.BlockSpec((fdim, two_f), lambda i: (0, 0)),
            pl.BlockSpec((1, two_f), lambda i: (0, 0)),
        ],
        out_specs=pl.BlockSpec((tm, two_f), lambda i: (i, 0)),
        out_shape=jax.ShapeDtypeStruct((pm, two_f), jnp.float32),
        compiler_params=pltpu.CompilerParams(
            dimension_semantics=("parallel",),
            vmem_limit_bytes=VMEM_LIMIT,
        ),
    )(s_cat_p, t_cat_p, s_fea_p, t_fea_p, w_sc, w_sf, w_tc, w_tf, b)

    return out[:n_user] if pm != n_user else out


# ----------------------------------------------------------------------------
# Parameter init (deterministic, Kipf / nn.Linear style uniform)
# ----------------------------------------------------------------------------
def _init_gcn(key, nfeat, nhid):
    kw, kb = jax.random.split(key)
    stdv = 1.0 / jnp.sqrt(jnp.float32(nhid))
    w = jax.random.uniform(kw, (nfeat, nhid), jnp.float32, -stdv, stdv)
    b = jax.random.uniform(kb, (nhid,), jnp.float32, -stdv, stdv)
    return w, b


def _init_linear(key, fan_in, fan_out):
    kw, kb = jax.random.split(key)
    bound = 1.0 / jnp.sqrt(jnp.float32(fan_in))
    w = jax.random.uniform(kw, (fan_out, fan_in), jnp.float32, -bound, bound)  # torch layout
    b = jax.random.uniform(kb, (fan_out,), jnp.float32, -bound, bound)
    return w, b


def init_params(key, feature_dim=FEATURE_DIM, hidden_dim=HIDDEN_DIM):
    keys = jax.random.split(key, 10)
    return {
        "gc1": _init_gcn(keys[0], feature_dim, hidden_dim),
        "gc2": _init_gcn(keys[1], feature_dim, hidden_dim),
        "gc3_mean": _init_gcn(keys[2], hidden_dim, feature_dim),
        "gc3_logstd": _init_gcn(keys[3], hidden_dim, feature_dim),
        "gc4_mean": _init_gcn(keys[4], hidden_dim, feature_dim),
        "gc4_logstd": _init_gcn(keys[5], hidden_dim, feature_dim),
        "union": {
            "source_mean": _init_linear(keys[6], 2 * feature_dim, feature_dim),
            "source_logstd": _init_linear(keys[7], 2 * feature_dim, feature_dim),
            "target_mean": _init_linear(keys[8], 2 * feature_dim, feature_dim),
            "target_logstd": _init_linear(keys[9], 2 * feature_dim, feature_dim),
        },
    }


# ----------------------------------------------------------------------------
# Full forward (glue in plain JAX, hot paths in Pallas)
# ----------------------------------------------------------------------------
def last_layer_cross_forward(params, source_ufea, target_ufea,
                             source_UV_adj, source_VU_adj,
                             target_UV_adj, target_VU_adj, rate=RATE):
    fdim = source_ufea.shape[1]

    # Layer 1: item nodes aggregate user features.
    s_ho = gcn(source_ufea, source_VU_adj, *params["gc1"])     # (n_item_s, H)
    t_ho = gcn(target_ufea, target_VU_adj, *params["gc2"])     # (n_item_t, H)

    # Layer 2, mean/logstd fused along the output axis so each UV adjacency is
    # streamed from HBM exactly once.
    w3 = jnp.concatenate([params["gc3_mean"][0], params["gc3_logstd"][0]], axis=1)
    b3 = jnp.concatenate([params["gc3_mean"][1], params["gc3_logstd"][1]])
    s_cat = gcn(s_ho, source_UV_adj, w3, b3)                   # (n_user, 2F)

    w4 = jnp.concatenate([params["gc4_mean"][0], params["gc4_logstd"][0]], axis=1)
    b4 = jnp.concatenate([params["gc4_mean"][1], params["gc4_logstd"][1]])
    t_cat = gcn(t_ho, target_UV_adj, w4, b4)                   # (n_user, 2F)

    out_cat = union_mix(s_cat, t_cat, source_ufea, target_ufea, params["union"], rate)
    return out_cat[:, :fdim], out_cat[:, fdim:]


# ----------------------------------------------------------------------------
# Pure-JAX reference (unfused, for sanity check)
# ----------------------------------------------------------------------------
def _ref_gcn(x, adj, w, b, alpha=LEAKY_ALPHA):
    out = adj @ (x @ w) + b
    return jnp.where(out > 0.0, out, alpha * out)


def _ref_forward(params, s_ufea, t_ufea, s_uv, s_vu, t_uv, t_vu, rate=RATE):
    s_ho = _ref_gcn(s_ufea, s_vu, *params["gc1"])
    s_m = _ref_gcn(s_ho, s_uv, *params["gc3_mean"])
    s_l = _ref_gcn(s_ho, s_uv, *params["gc3_logstd"])
    t_ho = _ref_gcn(t_ufea, t_vu, *params["gc2"])
    t_m = _ref_gcn(t_ho, t_uv, *params["gc4_mean"])
    t_l = _ref_gcn(t_ho, t_uv, *params["gc4_logstd"])

    def lin(ho, fea, wb):
        w, b = wb
        return jnp.concatenate([ho, fea], axis=1) @ w.T + b

    u = params["union"]
    sm = lin(s_m, s_ufea, u["source_mean"])
    sl = lin(s_l, s_ufea, u["source_logstd"])
    tm = lin(t_m, t_ufea, u["target_mean"])
    tl = lin(t_l, t_ufea, u["target_logstd"])
    return rate * sm + (1 - rate) * tm, rate * sl + (1 - rate) * tl


if __name__ == "__main__":
    key = jax.random.PRNGKey(0)
    k_param, k_sf, k_tf, k_a1, k_a2, k_a3, k_a4 = jax.random.split(key, 7)

    n_user, n_item_s, n_item_t = 8, 12, 10
    params = init_params(k_param)

    source_ufea = jax.random.normal(k_sf, (n_user, FEATURE_DIM), jnp.float32)
    target_ufea = jax.random.normal(k_tf, (n_user, FEATURE_DIM), jnp.float32)

    def make_adj(k, rows, cols):
        a = jax.random.uniform(k, (rows, cols), jnp.float32)
        return a / jnp.sum(a, axis=1, keepdims=True)  # row-normalized adjacency

    source_UV_adj = make_adj(k_a1, n_user, n_item_s)
    source_VU_adj = make_adj(k_a2, n_item_s, n_user)
    target_UV_adj = make_adj(k_a3, n_user, n_item_t)
    target_VU_adj = make_adj(k_a4, n_item_t, n_user)

    out_mean, out_logstd = last_layer_cross_forward(
        params, source_ufea, target_ufea,
        source_UV_adj, source_VU_adj, target_UV_adj, target_VU_adj)
    jax.block_until_ready((out_mean, out_logstd))

    ref_mean, ref_logstd = _ref_forward(
        params, source_ufea, target_ufea,
        source_UV_adj, source_VU_adj, target_UV_adj, target_VU_adj)
    assert out_mean.shape == (n_user, FEATURE_DIM)
    assert out_logstd.shape == (n_user, FEATURE_DIM)
    assert jnp.allclose(out_mean, ref_mean, atol=1e-4, rtol=1e-4)
    assert jnp.allclose(out_logstd, ref_logstd, atol=1e-4, rtol=1e-4)

    print("KERNEL_OK")
</pallas_src>

<mosaic_0001>
module attributes {stable_mosaic.version = 11 : i64} {
  func.func @_support_kernel(%arg0: i32, %arg1: memref<8x16xf32, #tpu.memory_space<vmem>>, %arg2: memref<16x32xf32, #tpu.memory_space<vmem>>, %arg3: memref<8x32xf32, #tpu.memory_space<vmem>>) attributes {dimension_semantics = [#tpu.dimension_semantics<parallel>], iteration_bounds = array<i64: 1>, scalar_prefetch = 0 : i64, scratch_operands = 0 : i64, tpu.core_type = #tpu.core_type<tc>, window_params = [{transform_indices = @transform_0, window_bounds = array<i64: 8, 16>}, {pipeline_mode = #tpu.pipeline_mode<synchronous>, transform_indices = @transform_1, window_bounds = array<i64: 16, 32>}, {transform_indices = @transform_2, window_bounds = array<i64: 8, 32>}]} {
    %c0 = arith.constant 0 : index
    %c0_0 = arith.constant 0 : index
    %0 = vector.load %arg1[%c0, %c0_0] : memref<8x16xf32, #tpu.memory_space<vmem>>, vector<8x16xf32>
    %c0_1 = arith.constant 0 : index
    %c0_2 = arith.constant 0 : index
    %1 = vector.load %arg2[%c0_1, %c0_2] : memref<16x32xf32, #tpu.memory_space<vmem>>, vector<16x32xf32>
    %cst = arith.constant dense<0.000000e+00> : vector<8x32xf32>
    %2 = tpu.matmul %0, %1, %cst {dimension_numbers = #tpu.dot_dimension_numbers<[1], [0], [0], [1], [0, 0, 1, 1], [], []>} : vector<8x16xf32>, vector<16x32xf32>, vector<8x32xf32> -> vector<8x32xf32>
    %c0_3 = arith.constant 0 : index
    %c0_4 = arith.constant 0 : index
    %3 = vector.load %arg3[%c0_3, %c0_4] : memref<8x32xf32, #tpu.memory_space<vmem>>, vector<8x32xf32>
    tpu.vector_store %arg3[%c0_3, %c0_4], %2 {strides = array<i32>} : memref<8x32xf32, #tpu.memory_space<vmem>>, vector<8x32xf32>,
    return
  }
  func.func @transform_0(%arg0: i32) -> (i32, i32) {
    %c0_i32 = arith.constant 0 : i32
    %c0_i32_0 = arith.constant 0 : i32
    return %arg0, %c0_i32 : i32, i32
  }
  func.func @transform_1(%arg0: i32) -> (i32, i32) {
    %c0_i32 = arith.constant 0 : i32
    %c0_i32_0 = arith.constant 0 : i32
    %c0_i32_1 = arith.constant 0 : i32
    return %c0_i32, %c0_i32_0 : i32, i32
  }
  func.func @transform_2(%arg0: i32) -> (i32, i32) {
    %c0_i32 = arith.constant 0 : i32
    %c0_i32_0 = arith.constant 0 : i32
    return %arg0, %c0_i32 : i32, i32
  }
}

</mosaic_0001>

<bundles_post_ra>
// kernel: tpu_custom_call.1
= control target key start
LH: loop header
LB: loop body
LE: loop exit
PB: predicated region body
PF: predicated region fallthrough
CT: control target
= control target key end

     0   :  { %7 = vsyncpa [#allocation3], 0  ;;  %s293_s0 = inlined_call_operand.hbm [shape: f32[8,16], index: 0, kind: input, shape index: {}]   ;;  %s294_s1 = inlined_call_operand.hbm [shape: f32[16,32], index: 1, kind: input, shape index: {}]   ;;  %s295_s2 = inlined_call_operand.hbm [shape: f32[8,32], index: 2, kind: output, shape index: {}]  }
   0x1   :  { %8 = vsyncpa [#allocation6], 0 }
   0x2   :  { %9 = vsyncpa [#allocation4], 0  ;;  %s227_s9 = smov [#allocation2]   ;;  %s228_s11 = smov [#allocation5]  }
   0x3   :  { %s16_s10 = sshll.u32 %s227_s9, 4  ;;  %s25_s12 = sshll.u32 %s228_s11, 4  ;;  %s17_s10 = int_to_ptr.vmem [resolvable:$true] %s16_s10  ;;  %s250_s12 = int_to_ptr.vmem [resolvable:$true] %s25_s12 }
   0x4   :  { %s155_s15 = scalar_lea.hbm %s293_s0, 128 }
   0x5   :  { %p156_p0 = scmp.ne.s32.totalorder %s293_s0, %s155_s15  ;;  %p159_p1 = scmp.lt.u32.totalorder %s155_s15, %s293_s0 }
   0x7   :  { %p161_p2 = pnand %p159_p1, %p156_p0 }
   0x9   :  { %164 = shalt.err (!%p161_p2)
}
   0xa   :  { %s165_s20 = scalar_lea.vmem %s17_s10, 128  ;;  %p170_p4 = scmp.lt.s32.totalorder %s17_s10, %s17_s10 }
   0xb   :  { %p166_p3 = scmp.ne.s32.totalorder %s17_s10, %s165_s20  ;;  %p171_p5 = scmp.lt.s32.totalorder %s165_s20, %s165_s20 }
   0xd   :  { %p172_p6 = por %p171_p5, %p170_p4 }
   0xf   :  { %p173_p7 = pnand %p172_p6, %p166_p3 }
  0x11   :  { %176 = shalt.err (!%p173_p7)
}
  0x12   :  { %19 = dma.hbm_to_vmem [thread:$0]  %s293_s0, 128, %s17_s10, [#allocation3]  }
  0x13   :  { %s177_s25 = scalar_lea.hbm %s294_s1, 256 }
  0x14   :  { %p178_p8 = scmp.ne.s32.totalorder %s294_s1, %s177_s25  ;;  %p181_p9 = scmp.lt.u32.totalorder %s177_s25, %s294_s1 }
  0x16   :  { %p183_p10 = pnand %p181_p9, %p178_p8 }
  0x18   :  { %186 = shalt.err (!%p183_p10)
}
  0x19   :  { %s187_s30 = scalar_lea.vmem %s250_s12, 256  ;;  %p192_p12 = scmp.lt.s32.totalorder %s250_s12, %s250_s12 }
  0x1a   :  { %p188_p11 = scmp.ne.s32.totalorder %s250_s12, %s187_s30  ;;  %p193_p13 = scmp.lt.s32.totalorder %s187_s30, %s187_s30 }
  0x1c   :  { %p194_p0 = por %p193_p13, %p192_p12 }
  0x1e   :  { %p195_p1 = pnand %p194_p0, %p188_p11 }
  0x20   :  { %198 = shalt.err (!%p195_p1)
}
  0x21   :  { %s229_s0 = smov 128   ;;  %s230_s3 = smov 8  }
  0x22   :  { %31 = dma.hbm_to_vmem [thread:$0]  %s294_s1, 256, %s250_s12, [#allocation6], %s229_s0, %s229_s0, %s230_s3  }
  0x23   :  { %221 = dma.done.wait [#allocation3], 128  }
  0x24   :  { %222 = vsyncadd [#allocation3], 4294967168 }
  0x25   :  { %223 = dma.done.wait [#allocation6], 256  }
  0x26   :  { %224 = vsyncadd [#allocation6], 4294967040  ;;  %v231_v0 = vmov 0.0|0.0   ;;  %vm232_vm0 = vmmov 0   ;;  %v233_v1 = vmov 0.0   ;;  %v39_v2 = vld [vmem:[#allocation5] sm:$0xff] }
  0x27   :  { %144 = vmatprep.subr.bf16.mxu0 %v231_v0  ;;  %141 = vmatprep.mubr.msk.f32.mxu0 %vm232_vm0, %v233_v1  ;;  %v40_v3 = vld [vmem:[#allocation5 + $0x8] sm:$0xff]  ;;  %v38_v5 = vld [vmem:[#allocation2] sm:$0xff]  ;;  %vm41_vm1 = vcmask 130048   ;;  %s234_s6 = smov [#allocation7]   ;;  %vm115_vm2 = vcmask 261120  }
  0x28   :  { %v145_v4 = vpack.c.bf16 %v40_v3, %v39_v2  ;;  %s123_s7 = sshll.u32 %s234_s6, 4  ;;  %s124_s7 = int_to_ptr.vmem [resolvable:$true] %s123_s7 }
  0x29   :  { %s199_s1 = scalar_lea.vmem %s124_s7, 128  ;;  %p204_p3 = scmp.lt.s32.totalorder %s124_s7, %s124_s7 }
  0x2a   :  { %146 = vmatpush3.bf16.msra.mxu0 %v145_v4  ;;  %p200_p2 = scmp.ne.s32.totalorder %s124_s7, %s199_s1  ;;  %p205_p4 = scmp.lt.s32.totalorder %s199_s1, %s199_s1 }
  0x2c   :  { %p206_p5 = por %p205_p4, %p204_p3 }
  0x2d   :  { %142 = vmatmul.mubr.msk.f32.vlgmr.msra.gmra.mrb[0].mxu0 %vm41_vm1, %v38_v5 }
  0x2e   :  { %p207_p6 = pnand %p206_p5, %p200_p2 }
 0x100   :  { %v111_v6 = vpop.f32.mrb[0].mxu0 }
 0x101   :  { %v143_v7 = vpop.f32.mrb[1].mxu0  ;;  %116 = vst.msk [vmem:[#allocation7] sm:$0xff] %vm115_vm2, %v111_v6 }
 0x102   :  { %210 = shalt.err (!%p207_p6)
}
 0x103   :  { %s211_s10 = scalar_lea.hbm %s295_s2, 128 }
 0x104   :  { %p212_p7 = scmp.ne.s32.totalorder %s295_s2, %s211_s10  ;;  %p215_p8 = scmp.lt.u32.totalorder %s211_s10, %s295_s2 }
 0x106   :  { %p217_p9 = pnand %p215_p8, %p212_p7 }
 0x108   :  { %220 = shalt.err (!%p217_p9)
}
 0x109   :  { %126 = dma.vmem_to_hbm [thread:$0]  %s124_s7, 128, %s295_s2, [#allocation4]  }
 0x10a   :  { %225 = dma.done.wait [#allocation4], 128  }
 0x10b   :  { %226 = vsyncadd [#allocation4], 4294967168 }
 0x10c   :  { %130 = vsyncpa [#allocation3], 1 }
 0x10d   :  { %131 = vsyncpa [#allocation6], 1 }
 0x10e   :  { %132 = vsyncpa [#allocation4], 1 }

</bundles_post_ra>
